<compile_context>
chip_gen: v5e
topology: v5e:2x2
jax: 0.10.0
libtpu: 0.0.40
codegen_flags: <defaults>
</compile_context>

<pallas_src>
import functools

import jax
import jax.numpy as jnp
from jax.experimental import pallas as pl
from jax.experimental.pallas import tpu as pltpu

LN_EPS = 1e-12  # ln_eps default in the module


def _shifted(x, off):
    """shifted[:, t, :] = x[:, t + off, :], zero outside [0, T). Static off."""
    if off == 0:
        return x
    Bt, T, C = x.shape
    zeros = jnp.zeros((Bt, abs(off), C), x.dtype)
    if off > 0:
        return jnp.concatenate([x[:, off:, :], zeros], axis=1)
    return jnp.concatenate([zeros, x[:, :T + off, :]], axis=1)


def _layer_norm(y, gamma, beta):
    # One-pass form: two independent lane reductions (mean, E[x^2]) instead of
    # a serialized mean -> subtract -> mean((y-mean)^2) chain.
    mean = jnp.mean(y, axis=-1, keepdims=True)
    msq = jnp.mean(y * y, axis=-1, keepdims=True)
    var = jnp.maximum(msq - mean * mean, 0.0)
    return (y - mean) * jax.lax.rsqrt(var + LN_EPS) * gamma + beta


def duration_predictor_kernel(
    x_ref, mask_ref,
    w1_ref, b1_ref, g1_ref, bt1_ref,
    w2_ref, b2_ref, g2_ref, bt2_ref,
    wh_ref, bh_ref,
    out_ref,
    *, kernel_size,
):
    Bt, T, c_in = x_ref.shape
    K = kernel_size
    half = K // 2                      # 'SAME' padding amount (odd K)
    n_chans = w1_ref.shape[1]
    n_out = wh_ref.shape[1]
    M = Bt * T

    x = x_ref[...].astype(jnp.float32)         # (Bt, T, c_in)
    mask = mask_ref[...].astype(jnp.float32)   # (Bt, T, 1)
    mask_flat = mask.reshape(M, 1)
    # Hoisted broadcast, reused by both conv layers (JAX does not CSE broadcasts).
    mask_full = jnp.broadcast_to(mask_flat, (M, n_chans))

    # ---- conv layer 1: im2col -> single MXU pass (contraction K*c_in) ----
    cols1 = jnp.concatenate([_shifted(x, k - half) for k in range(K)], axis=-1)
    h = jnp.dot(cols1.reshape(M, K * c_in), w1_ref[...],
                preferred_element_type=jnp.float32) + b1_ref[...]
    h = jnp.maximum(h, 0.0)
    h = _layer_norm(h, g1_ref[...], bt1_ref[...])
    # TODO(synk): FairseqDropout is identity in eval mode; training-time dropout not implemented.
    h = h * mask_full

    # ---- conv layer 2: im2col -> single MXU pass (contraction K*n_chans) ----
    h3 = h.reshape(Bt, T, n_chans)
    cols2 = jnp.concatenate([_shifted(h3, k - half) for k in range(K)], axis=-1)
    h2 = jnp.dot(cols2.reshape(M, K * n_chans), w2_ref[...],
                 preferred_element_type=jnp.float32) + b2_ref[...]
    h2 = jnp.maximum(h2, 0.0)
    h2 = _layer_norm(h2, g2_ref[...], bt2_ref[...])
    h2 = h2 * mask_full

    # ---- fused output heads: [werdur | to_be_edited] in one matmul ----
    heads = jnp.dot(h2, wh_ref[...], preferred_element_type=jnp.float32) + bh_ref[...]
    heads = heads * mask_flat
    out_ref[...] = heads.reshape(Bt, T, n_out).astype(out_ref.dtype)


def duration_predictor(xs, x_nonpadding, params, *, block_b=None):
    """xs: (B, T, idim) float32, x_nonpadding: (B, T) float32 {0,1}."""
    B, T, idim = xs.shape
    K, c_in, n_chans = params["w1"].shape
    assert c_in == idim
    assert K % 2 == 1, "SAME-padding path only matches PyTorch for odd kernel_size"
    tbe_size = params["we"].shape[1]
    n_out = 1 + tbe_size

    # Flatten conv weights to im2col layout (K*C_in, C_out); fuse the two heads.
    w1f = params["w1"].reshape(K * idim, n_chans)
    w2f = params["w2"].reshape(K * n_chans, n_chans)
    wh = jnp.concatenate([params["wwd"], params["we"]], axis=1)   # (n_chans, n_out)
    bh = jnp.concatenate([params["bwd"], params["be"]], axis=1)   # (1, n_out)

    # Batch tile: aim for >= ~256 matmul rows per grid step.
    if block_b is None:
        block_b = max(1, min(B, pl.cdiv(256, T)))
    Tp = ((T + 7) // 8) * 8                       # sublane-aligned sequence length
    Bp = pl.cdiv(B, block_b) * block_b
    nb = Bp // block_b

    # Zero-pad data and mask; padded positions have mask 0, so valid outputs are
    # identical to the unpadded computation (zero pad == SAME conv zero pad).
    xs_p = jnp.zeros((Bp, Tp, idim), jnp.float32).at[:B, :T, :].set(
        xs.astype(jnp.float32))
    mask_p = jnp.zeros((Bp, Tp, 1), jnp.float32).at[:B, :T, 0].set(
        x_nonpadding.astype(jnp.float32))

    def full_spec(arr):
        nd = arr.ndim
        return pl.BlockSpec(arr.shape, lambda b, _nd=nd: (0,) * _nd)

    grid_spec = pltpu.PrefetchScalarGridSpec(
        num_scalar_prefetch=0,
        grid=(nb,),
        in_specs=[
            pl.BlockSpec((block_b, Tp, idim), lambda b: (b, 0, 0)),
            pl.BlockSpec((block_b, Tp, 1), lambda b: (b, 0, 0)),
            full_spec(w1f), full_spec(params["b1"]),
            full_spec(params["g1"]), full_spec(params["bt1"]),
            full_spec(w2f), full_spec(params["b2"]),
            full_spec(params["g2"]), full_spec(params["bt2"]),
            full_spec(wh), full_spec(bh),
        ],
        out_specs=pl.BlockSpec((block_b, Tp, n_out), lambda b: (b, 0, 0)),
    )

    out = pl.pallas_call(
        functools.partial(duration_predictor_kernel, kernel_size=K),
        out_shape=jax.ShapeDtypeStruct((Bp, Tp, n_out), jnp.float32),
        grid_spec=grid_spec,
        compiler_params=pltpu.CompilerParams(
            dimension_semantics=("parallel",),
            vmem_limit_bytes=32 * 1024 * 1024),
    )(xs_p, mask_p,
      w1f, params["b1"], params["g1"], params["bt1"],
      w2f, params["b2"], params["g2"], params["bt2"],
      wh, bh)

    out = out[:B, :T, :]
    werdur = out[:, :, :1]
    to_be_edited = out[:, :, 1:]
    return werdur, to_be_edited


def init_params(key, idim, n_chans, kernel_size, to_be_edited_size=1):
    ks = jax.random.split(key, 6)
    scale = 0.02
    # Conv weights stored as (K, C_in, C_out) (torch Conv1d weight permuted (2,1,0));
    # biases / LN params as (1, C).
    params = {
        "w1": scale * jax.random.normal(ks[0], (kernel_size, idim, n_chans), jnp.float32),
        "b1": jnp.zeros((1, n_chans), jnp.float32),
        "g1": jnp.ones((1, n_chans), jnp.float32),
        "bt1": jnp.zeros((1, n_chans), jnp.float32),
        "w2": scale * jax.random.normal(ks[1], (kernel_size, n_chans, n_chans), jnp.float32),
        "b2": jnp.zeros((1, n_chans), jnp.float32),
        "g2": jnp.ones((1, n_chans), jnp.float32),
        "bt2": jnp.zeros((1, n_chans), jnp.float32),
        "wwd": scale * jax.random.normal(ks[2], (n_chans, 1), jnp.float32),
        "bwd": jnp.zeros((1, 1), jnp.float32),
        "we": scale * jax.random.normal(ks[3], (n_chans, to_be_edited_size), jnp.float32),
        "be": jnp.zeros((1, to_be_edited_size), jnp.float32),
    }
    return params


if __name__ == "__main__":
    B, T, IDIM, N_CHANS, KSIZE = 2, 16, 32, 128, 3

    key = jax.random.PRNGKey(0)
    k_x, k_p = jax.random.split(key)
    xs = jax.random.normal(k_x, (B, T, IDIM), jnp.float32)

    # x_nonpadding: batch 0 fully valid, batch 1 has 4 trailing padded frames.
    mask = jnp.ones((B, T), jnp.float32)
    mask = mask.at[1, T - 4:].set(0.0)

    params = init_params(k_p, IDIM, N_CHANS, KSIZE)

    werdur, to_be_edited = duration_predictor(xs, mask, params)
    jax.block_until_ready((werdur, to_be_edited))

    assert werdur.shape == (B, T, 1) and to_be_edited.shape == (B, T, 1)
    print("KERNEL_OK")
</pallas_src>

<mosaic_0001>
module attributes {stable_mosaic.version = 11 : i64} {
  func.func @duration_predictor_kernel(%arg0: i32, %arg1: memref<2x16x32xf32, #tpu.memory_space<vmem>>, %arg2: memref<2x16x1xf32, #tpu.memory_space<vmem>>, %arg3: memref<96x128xf32, #tpu.memory_space<vmem>>, %arg4: memref<1x128xf32, #tpu.memory_space<vmem>>, %arg5: memref<1x128xf32, #tpu.memory_space<vmem>>, %arg6: memref<1x128xf32, #tpu.memory_space<vmem>>, %arg7: memref<384x128xf32, #tpu.memory_space<vmem>>, %arg8: memref<1x128xf32, #tpu.memory_space<vmem>>, %arg9: memref<1x128xf32, #tpu.memory_space<vmem>>, %arg10: memref<1x128xf32, #tpu.memory_space<vmem>>, %arg11: memref<128x2xf32, #tpu.memory_space<vmem>>, %arg12: memref<1x2xf32, #tpu.memory_space<vmem>>, %arg13: memref<2x16x2xf32, #tpu.memory_space<vmem>>) attributes {dimension_semantics = [#tpu.dimension_semantics<parallel>], iteration_bounds = array<i64: 1>, scalar_prefetch = 0 : i64, scratch_operands = 0 : i64, tpu.core_type = #tpu.core_type<tc>, window_params = [{transform_indices = @transform_0, window_bounds = array<i64: 2, 16, 32>}, {transform_indices = @transform_1, window_bounds = array<i64: 2, 16, 1>}, {pipeline_mode = #tpu.pipeline_mode<synchronous>, transform_indices = @transform_2, window_bounds = array<i64: 96, 128>}, {pipeline_mode = #tpu.pipeline_mode<synchronous>, transform_indices = @transform_3, window_bounds = array<i64: 1, 128>}, {pipeline_mode = #tpu.pipeline_mode<synchronous>, transform_indices = @transform_4, window_bounds = array<i64: 1, 128>}, {pipeline_mode = #tpu.pipeline_mode<synchronous>, transform_indices = @transform_5, window_bounds = array<i64: 1, 128>}, {pipeline_mode = #tpu.pipeline_mode<synchronous>, transform_indices = @transform_6, window_bounds = array<i64: 384, 128>}, {pipeline_mode = #tpu.pipeline_mode<synchronous>, transform_indices = @transform_7, window_bounds = array<i64: 1, 128>}, {pipeline_mode = #tpu.pipeline_mode<synchronous>, transform_indices = @transform_8, window_bounds = array<i64: 1, 128>}, {pipeline_mode = #tpu.pipeline_mode<synchronous>, transform_indices = @transform_9, window_bounds = array<i64: 1, 128>}, {pipeline_mode = #tpu.pipeline_mode<synchronous>, transform_indices = @transform_10, window_bounds = array<i64: 128, 2>}, {pipeline_mode = #tpu.pipeline_mode<synchronous>, transform_indices = @transform_11, window_bounds = array<i64: 1, 2>}, {transform_indices = @transform_12, window_bounds = array<i64: 2, 16, 2>}]} {
    %c0 = arith.constant 0 : index
    %c0_0 = arith.constant 0 : index
    %c0_1 = arith.constant 0 : index
    %0 = vector.load %arg1[%c0, %c0_0, %c0_1] : memref<2x16x32xf32, #tpu.memory_space<vmem>>, vector<2x16x32xf32>
    %c0_2 = arith.constant 0 : index
    %c0_3 = arith.constant 0 : index
    %c0_4 = arith.constant 0 : index
    %1 = vector.load %arg2[%c0_2, %c0_3, %c0_4] : memref<2x16x1xf32, #tpu.memory_space<vmem>>, vector<2x16x1xf32>
    %2 = vector.shape_cast %1 : vector<2x16x1xf32> to vector<32x1xf32>
    %3 = vector.shape_cast %2 : vector<32x1xf32> to vector<32x1xf32>
    %4 = vector.broadcast %3 : vector<32x1xf32> to vector<32x128xf32>
    %cst = arith.constant 0.000000e+00 : f32
    %5 = vector.broadcast %cst : f32 to vector<2x1x32xf32>
    %6 = vector.extract_strided_slice %0 {offsets = [0, 0, 0], sizes = [2, 15, 32], strides = [1, 1, 1]} : vector<2x16x32xf32> to vector<2x15x32xf32>
    %7 = tpu.concatenate %5, %6 in 1 : vector<2x1x32xf32>, vector<2x15x32xf32> -> vector<2x16x32xf32>
    %cst_5 = arith.constant 0.000000e+00 : f32
    %8 = vector.broadcast %cst_5 : f32 to vector<2x1x32xf32>
    %9 = vector.extract_strided_slice %0 {offsets = [0, 1, 0], sizes = [2, 15, 32], strides = [1, 1, 1]} : vector<2x16x32xf32> to vector<2x15x32xf32>
    %10 = tpu.concatenate %9, %8 in 1 : vector<2x15x32xf32>, vector<2x1x32xf32> -> vector<2x16x32xf32>
    %11 = tpu.concatenate %7, %0, %10 in 2 : vector<2x16x32xf32>, vector<2x16x32xf32>, vector<2x16x32xf32> -> vector<2x16x96xf32>
    %12 = vector.shape_cast %11 : vector<2x16x96xf32> to vector<32x96xf32>
    %c0_6 = arith.constant 0 : index
    %c0_7 = arith.constant 0 : index
    %13 = vector.load %arg3[%c0_6, %c0_7] : memref<96x128xf32, #tpu.memory_space<vmem>>, vector<96x128xf32>
    %cst_8 = arith.constant dense<0.000000e+00> : vector<32x128xf32>
    %14 = tpu.matmul %12, %13, %cst_8 {dimension_numbers = #tpu.dot_dimension_numbers<[1], [0], [0], [1], [0, 0, 1, 1], [], []>} : vector<32x96xf32>, vector<96x128xf32>, vector<32x128xf32> -> vector<32x128xf32>
    %c0_9 = arith.constant 0 : index
    %c0_10 = arith.constant 0 : index
    %15 = vector.load %arg4[%c0_9, %c0_10] : memref<1x128xf32, #tpu.memory_space<vmem>>, vector<1x128xf32>
    %16 = vector.broadcast %15 : vector<1x128xf32> to vector<32x128xf32>
    %17 = arith.addf %14, %16 : vector<32x128xf32>
    %cst_11 = arith.constant 0.000000e+00 : f32
    %18 = vector.broadcast %cst_11 : f32 to vector<32x128xf32>
    %19 = arith.maximumf %17, %18 : vector<32x128xf32>
    %c0_12 = arith.constant 0 : index
    %c0_13 = arith.constant 0 : index
    %20 = vector.load %arg5[%c0_12, %c0_13] : memref<1x128xf32, #tpu.memory_space<vmem>>, vector<1x128xf32>
    %c0_14 = arith.constant 0 : index
    %c0_15 = arith.constant 0 : index
    %21 = vector.load %arg6[%c0_14, %c0_15] : memref<1x128xf32, #tpu.memory_space<vmem>>, vector<1x128xf32>
    %cst_16 = arith.constant dense<0.000000e+00> : vector<32xf32>
    %22 = vector.multi_reduction <add>, %19, %cst_16 [1] : vector<32x128xf32> to vector<32xf32>
    %23 = vector.shape_cast %22 : vector<32xf32> to vector<32x1xf32>
    %cst_17 = arith.constant 1.280000e+02 : f32
    %24 = vector.broadcast %cst_17 : f32 to vector<32x1xf32>
    %25 = arith.divf %23, %24 : vector<32x1xf32>
    %26 = arith.mulf %19, %19 : vector<32x128xf32>
    %cst_18 = arith.constant dense<0.000000e+00> : vector<32xf32>
    %27 = vector.multi_reduction <add>, %26, %cst_18 [1] : vector<32x128xf32> to vector<32xf32>
    %28 = vector.shape_cast %27 : vector<32xf32> to vector<32x1xf32>
    %cst_19 = arith.constant 1.280000e+02 : f32
    %29 = vector.broadcast %cst_19 : f32 to vector<32x1xf32>
    %30 = arith.divf %28, %29 : vector<32x1xf32>
    %31 = arith.mulf %25, %25 : vector<32x1xf32>
    %32 = arith.subf %30, %31 : vector<32x1xf32>
    %cst_20 = arith.constant 0.000000e+00 : f32
    %33 = vector.broadcast %cst_20 : f32 to vector<32x1xf32>
    %34 = arith.maximumf %32, %33 : vector<32x1xf32>
    %35 = vector.broadcast %25 : vector<32x1xf32> to vector<32x128xf32>
    %36 = arith.subf %19, %35 : vector<32x128xf32>
    %cst_21 = arith.constant 9.99999996E-13 : f32
    %37 = vector.broadcast %cst_21 : f32 to vector<32x1xf32>
    %38 = arith.addf %34, %37 : vector<32x1xf32>
    %39 = math.rsqrt %38 : vector<32x1xf32>
    %40 = vector.broadcast %39 : vector<32x1xf32> to vector<32x128xf32>
    %41 = arith.mulf %36, %40 : vector<32x128xf32>
    %42 = vector.broadcast %20 : vector<1x128xf32> to vector<32x128xf32>
    %43 = arith.mulf %41, %42 : vector<32x128xf32>
    %44 = vector.broadcast %21 : vector<1x128xf32> to vector<32x128xf32>
    %45 = arith.addf %43, %44 : vector<32x128xf32>
    %46 = arith.mulf %45, %4 : vector<32x128xf32>
    %47 = vector.shape_cast %46 : vector<32x128xf32> to vector<2x16x128xf32>
    %cst_22 = arith.constant 0.000000e+00 : f32
    %48 = vector.broadcast %cst_22 : f32 to vector<2x1x128xf32>
    %49 = vector.extract_strided_slice %47 {offsets = [0, 0, 0], sizes = [2, 15, 128], strides = [1, 1, 1]} : vector<2x16x128xf32> to vector<2x15x128xf32>
    %50 = tpu.concatenate %48, %49 in 1 : vector<2x1x128xf32>, vector<2x15x128xf32> -> vector<2x16x128xf32>
    %cst_23 = arith.constant 0.000000e+00 : f32
    %51 = vector.broadcast %cst_23 : f32 to vector<2x1x128xf32>
    %52 = vector.extract_strided_slice %47 {offsets = [0, 1, 0], sizes = [2, 15, 128], strides = [1, 1, 1]} : vector<2x16x128xf32> to vector<2x15x128xf32>
    %53 = tpu.concatenate %52, %51 in 1 : vector<2x15x128xf32>, vector<2x1x128xf32> -> vector<2x16x128xf32>
    %54 = tpu.concatenate %50, %47, %53 in 2 : vector<2x16x128xf32>, vector<2x16x128xf32>, vector<2x16x128xf32> -> vector<2x16x384xf32>
    %55 = vector.shape_cast %54 : vector<2x16x384xf32> to vector<32x384xf32>
    %c0_24 = arith.constant 0 : index
    %c0_25 = arith.constant 0 : index
    %56 = vector.load %arg7[%c0_24, %c0_25] : memref<384x128xf32, #tpu.memory_space<vmem>>, vector<384x128xf32>
    %cst_26 = arith.constant dense<0.000000e+00> : vector<32x128xf32>
    %57 = tpu.matmul %55, %56, %cst_26 {dimension_numbers = #tpu.dot_dimension_numbers<[1], [0], [0], [1], [0, 0, 1, 1], [], []>} : vector<32x384xf32>, vector<384x128xf32>, vector<32x128xf32> -> vector<32x128xf32>
    %c0_27 = arith.constant 0 : index
    %c0_28 = arith.constant 0 : index
    %58 = vector.load %arg8[%c0_27, %c0_28] : memref<1x128xf32, #tpu.memory_space<vmem>>, vector<1x128xf32>
    %59 = vector.broadcast %58 : vector<1x128xf32> to vector<32x128xf32>
    %60 = arith.addf %57, %59 : vector<32x128xf32>
    %cst_29 = arith.constant 0.000000e+00 : f32
    %61 = vector.broadcast %cst_29 : f32 to vector<32x128xf32>
    %62 = arith.maximumf %60, %61 : vector<32x128xf32>
    %c0_30 = arith.constant 0 : index
    %c0_31 = arith.constant 0 : index
    %63 = vector.load %arg9[%c0_30, %c0_31] : memref<1x128xf32, #tpu.memory_space<vmem>>, vector<1x128xf32>
    %c0_32 = arith.constant 0 : index
    %c0_33 = arith.constant 0 : index
    %64 = vector.load %arg10[%c0_32, %c0_33] : memref<1x128xf32, #tpu.memory_space<vmem>>, vector<1x128xf32>
    %cst_34 = arith.constant dense<0.000000e+00> : vector<32xf32>
    %65 = vector.multi_reduction <add>, %62, %cst_34 [1] : vector<32x128xf32> to vector<32xf32>
    %66 = vector.shape_cast %65 : vector<32xf32> to vector<32x1xf32>
    %cst_35 = arith.constant 1.280000e+02 : f32
    %67 = vector.broadcast %cst_35 : f32 to vector<32x1xf32>
    %68 = arith.divf %66, %67 : vector<32x1xf32>
    %69 = arith.mulf %62, %62 : vector<32x128xf32>
    %cst_36 = arith.constant dense<0.000000e+00> : vector<32xf32>
    %70 = vector.multi_reduction <add>, %69, %cst_36 [1] : vector<32x128xf32> to vector<32xf32>
    %71 = vector.shape_cast %70 : vector<32xf32> to vector<32x1xf32>
    %cst_37 = arith.constant 1.280000e+02 : f32
    %72 = vector.broadcast %cst_37 : f32 to vector<32x1xf32>
    %73 = arith.divf %71, %72 : vector<32x1xf32>
    %74 = arith.mulf %68, %68 : vector<32x1xf32>
    %75 = arith.subf %73, %74 : vector<32x1xf32>
    %cst_38 = arith.constant 0.000000e+00 : f32
    %76 = vector.broadcast %cst_38 : f32 to vector<32x1xf32>
    %77 = arith.maximumf %75, %76 : vector<32x1xf32>
    %78 = vector.broadcast %68 : vector<32x1xf32> to vector<32x128xf32>
    %79 = arith.subf %62, %78 : vector<32x128xf32>
    %cst_39 = arith.constant 9.99999996E-13 : f32
    %80 = vector.broadcast %cst_39 : f32 to vector<32x1xf32>
    %81 = arith.addf %77, %80 : vector<32x1xf32>
    %82 = math.rsqrt %81 : vector<32x1xf32>
    %83 = vector.broadcast %82 : vector<32x1xf32> to vector<32x128xf32>
    %84 = arith.mulf %79, %83 : vector<32x128xf32>
    %85 = vector.broadcast %63 : vector<1x128xf32> to vector<32x128xf32>
    %86 = arith.mulf %84, %85 : vector<32x128xf32>
    %87 = vector.broadcast %64 : vector<1x128xf32> to vector<32x128xf32>
    %88 = arith.addf %86, %87 : vector<32x128xf32>
    %89 = arith.mulf %88, %4 : vector<32x128xf32>
    %c0_40 = arith.constant 0 : index
    %c0_41 = arith.constant 0 : index
    %90 = vector.load %arg11[%c0_40, %c0_41] : memref<128x2xf32, #tpu.memory_space<vmem>>, vector<128x2xf32>
    %cst_42 = arith.constant dense<0.000000e+00> : vector<32x2xf32>
    %91 = tpu.matmul %89, %90, %cst_42 {dimension_numbers = #tpu.dot_dimension_numbers<[1], [0], [0], [1], [0, 0, 1, 1], [], []>} : vector<32x128xf32>, vector<128x2xf32>, vector<32x2xf32> -> vector<32x2xf32>
    %c0_43 = arith.constant 0 : index
    %c0_44 = arith.constant 0 : index
    %92 = vector.load %arg12[%c0_43, %c0_44] : memref<1x2xf32, #tpu.memory_space<vmem>>, vector<1x2xf32>
    %93 = vector.broadcast %92 : vector<1x2xf32> to vector<32x2xf32>
    %94 = arith.addf %91, %93 : vector<32x2xf32>
    %95 = vector.broadcast %2 : vector<32x1xf32> to vector<32x2xf32>
    %96 = arith.mulf %94, %95 : vector<32x2xf32>
    %97 = vector.shape_cast %96 : vector<32x2xf32> to vector<2x16x2xf32>
    %c0_45 = arith.constant 0 : index
    %c0_46 = arith.constant 0 : index
    %c0_47 = arith.constant 0 : index
    %98 = vector.load %arg13[%c0_45, %c0_46, %c0_47] : memref<2x16x2xf32, #tpu.memory_space<vmem>>, vector<2x16x2xf32>
    tpu.vector_store %arg13[%c0_45, %c0_46, %c0_47], %97 {strides = array<i32>} : memref<2x16x2xf32, #tpu.memory_space<vmem>>, vector<2x16x2xf32>,
    return
  }
  func.func @transform_0(%arg0: i32) -> (i32, i32, i32) {
    %c0_i32 = arith.constant 0 : i32
    %c0_i32_0 = arith.constant 0 : i32
    %c0_i32_1 = arith.constant 0 : i32
    return %arg0, %c0_i32, %c0_i32_0 : i32, i32, i32
  }
  func.func @transform_1(%arg0: i32) -> (i32, i32, i32) {
    %c0_i32 = arith.constant 0 : i32
    %c0_i32_0 = arith.constant 0 : i32
    %c0_i32_1 = arith.constant 0 : i32
    return %arg0, %c0_i32, %c0_i32_0 : i32, i32, i32
  }
  func.func @transform_2(%arg0: i32) -> (i32, i32) {
    %c0_i32 = arith.constant 0 : i32
    %c0_i32_0 = arith.constant 0 : i32
    %c0_i32_1 = arith.constant 0 : i32
    return %c0_i32, %c0_i32_0 : i32, i32
  }
  func.func @transform_3(%arg0: i32) -> (i32, i32) {
    %c0_i32 = arith.constant 0 : i32
    %c0_i32_0 = arith.constant 0 : i32
    %c0_i32_1 = arith.constant 0 : i32
    return %c0_i32, %c0_i32_0 : i32, i32
  }
  func.func @transform_4(%arg0: i32) -> (i32, i32) {
    %c0_i32 = arith.constant 0 : i32
    %c0_i32_0 = arith.constant 0 : i32
    %c0_i32_1 = arith.constant 0 : i32
    return %c0_i32, %c0_i32_0 : i32, i32
  }
  func.func @transform_5(%arg0: i32) -> (i32, i32) {
    %c0_i32 = arith.constant 0 : i32
    %c0_i32_0 = arith.constant 0 : i32
    %c0_i32_1 = arith.constant 0 : i32
    return %c0_i32, %c0_i32_0 : i32, i32
  }
  func.func @transform_6(%arg0: i32) -> (i32, i32) {
    %c0_i32 = arith.constant 0 : i32
    %c0_i32_0 = arith.constant 0 : i32
    %c0_i32_1 = arith.constant 0 : i32
    return %c0_i32, %c0_i32_0 : i32, i32
  }
  func.func @transform_7(%arg0: i32) -> (i32, i32) {
    %c0_i32 = arith.constant 0 : i32
    %c0_i32_0 = arith.constant 0 : i32
    %c0_i32_1 = arith.constant 0 : i32
    return %c0_i32, %c0_i32_0 : i32, i32
  }
  func.func @transform_8(%arg0: i32) -> (i32, i32) {
    %c0_i32 = arith.constant 0 : i32
    %c0_i32_0 = arith.constant 0 : i32
    %c0_i32_1 = arith.constant 0 : i32
    return %c0_i32, %c0_i32_0 : i32, i32
  }
  func.func @transform_9(%arg0: i32) -> (i32, i32) {
    %c0_i32 = arith.constant 0 : i32
    %c0_i32_0 = arith.constant 0 : i32
    %c0_i32_1 = arith.constant 0 : i32
    return %c0_i32, %c0_i32_0 : i32, i32
  }
  func.func @transform_10(%arg0: i32) -> (i32, i32) {
    %c0_i32 = arith.constant 0 : i32
    %c0_i32_0 = arith.constant 0 : i32
    %c0_i32_1 = arith.constant 0 : i32
    return %c0_i32, %c0_i32_0 : i32, i32
  }
  func.func @transform_11(%arg0: i32) -> (i32, i32) {
    %c0_i32 = arith.constant 0 : i32
    %c0_i32_0 = arith.constant 0 : i32
    %c0_i32_1 = arith.constant 0 : i32
    return %c0_i32, %c0_i32_0 : i32, i32
  }
  func.func @transform_12(%arg0: i32) -> (i32, i32, i32) {
    %c0_i32 = arith.constant 0 : i32
    %c0_i32_0 = arith.constant 0 : i32
    %c0_i32_1 = arith.constant 0 : i32
    return %arg0, %c0_i32, %c0_i32_0 : i32, i32, i32
  }
}

</mosaic_0001>

<bundles_post_ra>
// kernel: tpu_custom_call.1
= control target key start
LH: loop header
LB: loop body
LE: loop exit
PB: predicated region body
PF: predicated region fallthrough
CT: control target
= control target key end

     0   :  { %17 = vsyncpa [#allocation3], 0  ;;  %s779_s24 = smov [#allocation2]   ;;  %s780_s26 = smov 128   ;;  %s1151_s0 = inlined_call_operand.vmem [shape: f32[2,16,32], index: 0, kind: input, shape index: {}]   ;;  %s1152_s1 = inlined_call_operand.vmem [shape: f32[2,16,1], index: 1, kind: input, shape index: {}]   ;;  %s1153_s2 = inlined_call_operand.vmem [shape: f32[96,128], index: 2, kind: input, shape index: {}]   ;;  %s1154_s3 = inlined_call_operand.vmem [shape: f32[1,128], index: 3, kind: input, shape index: {}]   ;;  %s1155_s4 = inlined_call_operand.vmem [shape: f32[1,128], index: 4, kind: input, shape index: {}]   ;;  %s1156_s5 = inlined_call_operand.vmem [shape: f32[1,128], index: 5, kind: input, shape index: {}]   ;;  %s1157_s6 = inlined_call_operand.hbm [shape: f32[384,128], index: 6, kind: input, shape index: {}]   ;;  %s1158_s7 = inlined_call_operand.vmem [shape: f32[1,128], index: 7, kind: input, shape index: {}]   ;;  %s1159_s8 = inlined_call_operand.vmem [shape: f32[1,128], index: 8, kind: input, shape index: {}]   ;;  %s1160_s9 = inlined_call_operand.vmem [shape: f32[1,128], index: 9, kind: input, shape index: {}]   ;;  %s1161_s10 = inlined_call_operand.vmem [shape: f32[128,2], index: 10, kind: input, shape index: {}]   ;;  %s1162_s11 = inlined_call_operand.vmem [shape: f32[1,2], index: 11, kind: input, shape index: {}]   ;;  %s1163_s12 = inlined_call_operand.vmem [shape: f32[2,16,2], index: 12, kind: output, shape index: {}]  }
   0x1   :  { %s34_s23 = sshll.u32 %s1157_s6, 4  ;;  %s36_s25 = sshll.u32 %s779_s24, 4  ;;  %s35_s23 = int_to_ptr.hbm [resolvable:$true] %s34_s23  ;;  %s37_s25 = int_to_ptr.vmem [resolvable:$true] %s36_s25 }
   0x2   :  { %s781_s27 = smov 8  }
   0x3   :  { %42 = dma.hbm_to_vmem [thread:$0]  %s35_s23, 6144, %s37_s25, [#allocation3], %s780_s26, %s780_s26, %s781_s27  }
   0x4   :  { %777 = dma.done.wait [#allocation3], 6144  }
   0x5   :  { %778 = vsyncadd [#allocation3], 4294961152  ;;  %v57_v0 = vld [vmem:[%s1151_s0] sm:$0xff]  ;;  %v58_v1 = vld [vmem:[%s1151_s0 + $0x8] sm:$0xff]  ;;  %s782_s6 = smov 32   ;;  %vm102_vm0 = vcmask 1046528  }
   0x6   :  { %v60_v2 = vld [vmem:[%s1151_s0 + $0x18] sm:$0xff]  ;;  %113 = vrot.lane.b32.xlu0 %v57_v0, %s782_s6  ;;  %115 = vrot.lane.b32.xlu1 %v58_v1, %s782_s6  ;;  %v868_v3 = vld [vmem:[%s1151_s0 + $0x10] sm:$0xff]  ;;  %v103_v5 = vrot.slane %v57_v0, 1  ;;  %v104_v6 = vrot.slane %v58_v1, 1  ;;  %s783_s27 = smov 64   ;;  %v91_v19 = vrot.slane %v58_v1, 7 }
   0x7   :  { %v160_v4 = vld [vmem:[%s1153_s2 + $0x58] sm:$0xff]  ;;  %117 = vrot.lane.b32.xlu2 %v868_v3, %s782_s6  ;;  %v159_v7 = vld [vmem:[%s1153_s2 + $0x50] sm:$0xff]  ;;  %v106_v8 = vrot.slane %v868_v3, 1  ;;  %v158_v9 = vld [vmem:[%s1153_s2 + $0x48] sm:$0xff]  ;;  %v107_v10 = vrot.slane %v60_v2, 1  ;;  %v90_v20 = vrot.slane %v57_v0, 7 }
   0x8   :  { %182 = vmatpush.msra.mxu0 %v160_v4  ;;  %v157_v11 = vld [vmem:[%s1153_s2 + $0x40] sm:$0xff]  ;;  %v105_v12 = vsel %vm102_vm0, %v103_v5, %v104_v6  ;;  %v111_v13 = vsel %vm102_vm0, %v104_v6, 0.0  ;;  %v156_v15 = vld [vmem:[%s1153_s2 + $0x38] sm:$0xff]  ;;  %v155_v16 = vld [vmem:[%s1153_s2 + $0x30] sm:$0xff]  ;;  %vm89_vm1 = vcmask 1040384   ;;  %v94_v27 = vrot.slane %v60_v2, 7 }
   0x9   :  { %v108_v14 = vsel %vm102_vm0, %v106_v8, %v107_v10  ;;  %v154_v17 = vld [vmem:[%s1153_s2 + $0x28] sm:$0xff]  ;;  %v112_v18 = vsel %vm102_vm0, %v107_v10, 0.0  ;;  %v153_v21 = vld [vmem:[%s1153_s2 + $0x20] sm:$0xff]  ;;  %v92_v22 = vsel %vm89_vm1, %v90_v20, %v91_v19  ;;  %v152_v23 = vld [vmem:[%s1153_s2 + $0x18] sm:$0xff]  ;;  %v93_v28 = vrot.slane %v868_v3, 7 }
   0xa   :  { %183 = vmatpush.msra.mxu0 %v159_v7  ;;  %v151_v24 = vld [vmem:[%s1153_s2 + $0x10] sm:$0xff]  ;;  %v150_v25 = vld [vmem:[%s1153_s2 + $0x8] sm:$0xff]  ;;  %v149_v26 = vld [vmem:[%s1153_s2] sm:$0xff]  ;;  %vm139_vm2 = vcmask 261120   ;;  %v100_v32 = vsel %vm89_vm1, 0.0, %v90_v20  ;;  %vm144_vm3 = vcmask 523264  }
   0xb   :  { %v95_v29 = vsel %vm89_vm1, %v93_v28, %v94_v27  ;;  %vm165_vm4 = vcmask 785408   ;;  %v101_v40 = vsel %vm89_vm1, 0.0, %v93_v28  ;;  %v728_v48 = vld [vmem:[%s1154_s3] ss:$0 sm:$0xff]  ;;  %v784_v50 = vmov 0   ;;  %v63_v4 = vld [vmem:[%s1152_s1 + $0x10] sm:$0xff]  ;;  %vm1009_vm14 = vmneg %vm89_vm1 }
   0xc   :  { %184 = vmatpush.msra.mxu0 %v158_v9  ;;  %726 = vset.pattern.permute.xlu1 %v784_v50  ;;  %v61_v3 = vld [vmem:[%s1152_s1] sm:$0xff]  ;;  %v64_v5 = vld [vmem:[%s1152_s1 + $0x18] sm:$0xff]  ;;  %v785_v6 = vmov 128.0   ;;  %v403_v20 = vld [vmem:[#allocation2 + $0x168] sm:$0xff] }
   0xd   :  { %725 = vset.pattern.permute.xlu0 %v784_v50  ;;  %727 = vset.pattern.permute.xlu2 %v784_v50  ;;  %735 = vrcp.f32 %v785_v6  ;;  %v389_v9 = vld [vmem:[#allocation2 + $0xf8] sm:$0xff]  ;;  %v368_v28 = vld [vmem:[#allocation2 + $0x50] sm:$0xff]  ;;  %v363_v50 = vld [vmem:[#allocation2 + $0x28] sm:$0xff] }
   0xe   :  { %185 = vmatpush.msra.mxu0 %v157_v11  ;;  %127 = vrot.lane.b32.xlu0 %v105_v12, %s783_s27  ;;  %v373_v10 = vld [vmem:[#allocation2 + $0x78] sm:$0xff]  ;;  %v388_v11 = vld [vmem:[#allocation2 + $0xf0] sm:$0xff]  ;;  %v375_v6 = vld [vmem:[#allocation2 + $0x88] sm:$0xff] }
   0xf   :  { %129 = vrot.lane.b32.xlu1 %v111_v13, %s783_s27  ;;  %131 = vrot.lane.b32.xlu2 %v108_v14, %s783_s27  ;;  %v405_v13 = vld [vmem:[#allocation2 + $0x178] sm:$0xff]  ;;  %v372_v14 = vld [vmem:[#allocation2 + $0x70] sm:$0xff] }
  0x10   :  { %186 = vmatpush.msra.mxu0 %v156_v15  ;;  %439 = vmatpush.msra.mxu2 %v389_v9  ;;  %v387_v15 = vld [vmem:[#allocation2 + $0xe8] sm:$0xff]  ;;  %v401_v27 = vld [vmem:[#allocation2 + $0x158] sm:$0xff] }
  0x11   :  { %410 = vmatpush.msra.mxu1 %v373_v10  ;;  %468 = vmatpush.msra.mxu3 %v405_v13  ;;  %v359_v9 = vld [vmem:[#allocation2 + $0x8] sm:$0xff]  ;;  %v374_v10 = vld [vmem:[#allocation2 + $0x80] sm:$0xff] }
  0x12   :  { %187 = vmatpush.msra.mxu0 %v155_v16  ;;  %440 = vmatpush.msra.mxu2 %v388_v11  ;;  %v404_v16 = vld [vmem:[#allocation2 + $0x170] sm:$0xff]  ;;  %v358_v13 = vld [vmem:[#allocation2] sm:$0xff] }
  0x13   :  { %v736_v7 = vpop.eup %735  ;;  %411 = vmatpush.msra.mxu1 %v372_v14  ;;  %469 = vmatpush.msra.mxu3 %v404_v16 }
  0x14   :  { %188 = vmatpush.msra.mxu0 %v154_v17  ;;  %v222_v8 = vmul.f32 128.0, %v736_v7  ;;  %441 = vmatpush.msra.mxu2 %v387_v15  ;;  %v371_v17 = vld [vmem:[#allocation2 + $0x68] sm:$0xff]  ;;  %vm226_vm5 = vweird.f32 %v736_v7  ;;  %v390_v15 = vld [vmem:[#allocation2 + $0x100] sm:$0xff] }
  0x15   :  { %412 = vmatpush.msra.mxu1 %v371_v17  ;;  %470 = vmatpush.msra.mxu3 %v403_v20 }
  0x16   :  { %119 = vrot.lane.b32.xlu0 %v60_v2, %s782_s6  ;;  %189 = vmatpush.msra.mxu0 %v153_v21  ;;  %v62_v2 = vld [vmem:[%s1152_s1 + $0x8] sm:$0xff]  ;;  %v223_v12 = vsub.f32 1.0, %v222_v8  ;;  %v370_v21 = vld [vmem:[#allocation2 + $0x60] sm:$0xff]  ;;  %v392_v8 = vld [vmem:[#allocation2 + $0x110] sm:$0xff] }
  0x17   :  { %133 = vrot.lane.b32.xlu1 %v112_v18, %s783_s27  ;;  %v386_v18 = vld [vmem:[#allocation2 + $0xe0] sm:$0xff]  ;;  %413 = vmatpush.msra.mxu1 %v370_v21 }
  0x18   :  { %190 = vmatpush.msra.mxu0 %v152_v23  ;;  %v224_v19 = vmul.f32 %v736_v7, %v223_v12  ;;  %442 = vmatpush.msra.mxu2 %v386_v18  ;;  %v402_v23 = vld [vmem:[#allocation2 + $0x160] sm:$0xff]  ;;  %v391_v12 = vld [vmem:[#allocation2 + $0x108] sm:$0xff] }
  0x19   :  { %471 = vmatpush.msra.mxu3 %v402_v23 }
  0x1a   :  { %191 = vmatpush.msra.mxu0 %v151_v24  ;;  %v369_v24 = vld [vmem:[#allocation2 + $0x58] sm:$0xff] }
  0x1b   :  { %414 = vmatpush.msra.mxu1 %v369_v24  ;;  %472 = vmatpush.msra.mxu3 %v401_v27 }
  0x1c   :  { %192 = vmatpush.msra.mxu0 %v150_v25  ;;  %v384_v25 = vld [vmem:[#allocation2 + $0xd0] sm:$0xff] }
  0x1d   :  { %415 = vmatpush.msra.mxu1 %v368_v28 }
  0x1e   :  { %193 = vmatpush.msra.mxu0 %v149_v26  ;;  %v225_v26 = vadd.f32 %v736_v7, %v224_v19 }
  0x61   :  { %v118_v36 = vpop.permute.xlu2 %117 }
  0x62   :  { %v142_v41 = vsel %vm139_vm2, %v101_v40, %v118_v36  ;;  %v381_v36 = vld [vmem:[#allocation2 + $0xb8] sm:$0xff] }
  0x63   :  { %v365_v40 = vld [vmem:[#allocation2 + $0x38] sm:$0xff] }
  0x69   :  { %v132_v42 = vpop.permute.xlu2 %131 }
  0x6a   :  { %v147_v43 = vsel %vm144_vm3, %v142_v41, %v132_v42  ;;  %v380_v41 = vld [vmem:[#allocation2 + $0xb0] sm:$0xff] }
  0x78   :  { %v114_v30 = vpop.permute.xlu0 %113  ;;  %v116_v31 = vpop.permute.xlu1 %115 }
  0x79   :  { %v140_v33 = vsel %vm139_vm2, %v100_v32, %v114_v30  ;;  %v141_v37 = vsel %vm139_vm2, %v92_v22, %v116_v31  ;;  %v385_v22 = vld [vmem:[#allocation2 + $0xd8] sm:$0xff]  ;;  %v400_v30 = vld [vmem:[#allocation2 + $0x150] sm:$0xff]  ;;  %v367_v31 = vld [vmem:[#allocation2 + $0x48] sm:$0xff] }
  0x7a   :  { %443 = vmatpush.msra.mxu2 %v385_v22  ;;  %473 = vmatpush.msra.mxu3 %v400_v30  ;;  %v382_v32 = vld [vmem:[#allocation2 + $0xc0] sm:$0xff] }
  0x7b   :  { %416 = vmatpush.msra.mxu1 %v367_v31 }
  0x7c   :  { %444 = vmatpush.msra.mxu2 %v384_v25 }
  0x80   :  { %v128_v34 = vpop.permute.xlu0 %127 }
  0x81   :  { %v145_v35 = vsel %vm144_vm3, %v140_v33, %v128_v34  ;;  %v130_v38 = vpop.permute.xlu1 %129  ;;  %v966_v33 = vsel %vm226_vm5, %v736_v7, %v225_v26  ;;  %v399_v34 = vld [vmem:[#allocation2 + $0x148] sm:$0xff] }
  0x82   :  { %676 = vmatmul.msk.f32.vlgmr.msra.gmra.mxu0 %vm165_vm4, %v145_v35  ;;  %v146_v39 = vsel %vm144_vm3, %v141_v37, %v130_v38  ;;  %474 = vmatpush.msra.mxu3 %v399_v34  ;;  %v366_v35 = vld [vmem:[#allocation2 + $0x40] sm:$0xff] }
  0x83   :  { %417 = vmatpush.msra.mxu1 %v366_v35  ;;  %v398_v38 = vld [vmem:[#allocation2 + $0x140] sm:$0xff] }
  0x84   :  { %475 = vmatpush.msra.mxu3 %v398_v38 }
  0x85   :  { %418 = vmatpush.msra.mxu1 %v365_v40 }
  0x88   :  { %v120_v44 = vpop.permute.xlu0 %119 }
  0x89   :  { %v143_v45 = vsel %vm139_vm2, %v95_v29, %v120_v44  ;;  %v134_v46 = vpop.permute.xlu1 %133  ;;  %v383_v29 = vld [vmem:[#allocation2 + $0xc8] sm:$0xff] }
  0x8a   :  { %677 = vmatmul.msk.f32.gmra.mxu0 %vm165_vm4, %v146_v39  ;;  %v148_v47 = vsel %vm144_vm3, %v143_v45, %v134_v46  ;;  %445 = vmatpush.msra.mxu2 %v383_v29  ;;  %v364_v46 = vld [vmem:[#allocation2 + $0x30] sm:$0xff] }
  0x8b   :  { %419 = vmatpush.msra.mxu1 %v364_v46 }
  0x8c   :  { %446 = vmatpush.msra.mxu2 %v382_v32 }
  0x8d   :  { %420 = vmatpush.msra.mxu1 %v363_v50 }
  0x8e   :  { %447 = vmatpush.msra.mxu2 %v381_v36 }
  0x90   :  { %448 = vmatpush.msra.mxu2 %v380_v41 }
  0x92   :  { %678 = vmatmul.msk.f32.gmra.mxu0 %vm165_vm4, %v147_v43  ;;  %v397_v43 = vld [vmem:[#allocation2 + $0x138] sm:$0xff] }
  0x93   :  { %476 = vmatpush.msra.mxu3 %v397_v43 }
  0x9a   :  { %679 = vmatmul.msk.f32.gmra.mxu0 %vm165_vm4, %v148_v47  ;;  %v379_v47 = vld [vmem:[#allocation2 + $0xa8] sm:$0xff] }
  0x9b   :  { %449 = vmatpush.msra.mxu2 %v379_v47  ;;  %v729_v47 = vld [vmem:[%s1155_s4] ss:$0 sm:$0xff] }
  0xff   :  { %v195_v49 = vpop.f32.mrf.mxu0 }
 0x100   :  { %v196_v51 = vadd.f32 %v728_v48, %v195_v49 }
 0x102   :  { %v934_v52 = vmax.f32 %v196_v51, 0.0  ;;  %v378_v51 = vld [vmem:[#allocation2 + $0xa0] sm:$0xff] }
 0x103   :  { %450 = vmatpush.msra.mxu2 %v378_v51 }
 0x104   :  { %213 = vadd.xlane.f32.xlu2 %v934_v52  ;;  %v232_v53 = vmul.f32 %v934_v52, %v934_v52 }
 0x106   :  { %236 = vadd.xlane.f32.xlu1 %v232_v53  ;;  %v395_v53 = vld [vmem:[#allocation2 + $0x128] sm:$0xff] }
 0x107   :  { %v198_v54 = vpop.f32.mrf.mxu0 }
 0x108   :  { %v199_v55 = vadd.f32 %v728_v48, %v198_v54 }
 0x10a   :  { %v939_v56 = vmax.f32 %v199_v55, 0.0  ;;  %v362_v55 = vld [vmem:[#allocation2 + $0x20] sm:$0xff] }
 0x10b   :  { %421 = vmatpush.msra.mxu1 %v362_v55 }
 0x10c   :  { %215 = vadd.xlane.f32.xlu0 %v939_v56  ;;  %v233_v57 = vmul.f32 %v939_v56, %v939_v56 }
 0x10e   :  { %238 = vadd.xlane.f32.xlu2 %v233_v57  ;;  %v377_v57 = vld [vmem:[#allocation2 + $0x98] sm:$0xff] }
 0x10f   :  { %v201_v58 = vpop.f32.mrf.mxu0  ;;  %451 = vmatpush.msra.mxu2 %v377_v57 }
 0x110   :  { %v202_v59 = vadd.f32 %v728_v48, %v201_v58 }
 0x112   :  { %v944_v60 = vmax.f32 %v202_v59, 0.0  ;;  %v394_v59 = vld [vmem:[#allocation2 + $0x120] sm:$0xff] }
 0x114   :  { %v234_v61 = vmul.f32 %v944_v60, %v944_v60 }
 0x116   :  { %240 = vadd.xlane.f32.xlu1 %v234_v61  ;;  %217 = vadd.xlane.f32.xlu2 %v944_v60 }
 0x117   :  { %v204_v62 = vpop.f32.mrf.mxu0 }
 0x118   :  { %v205_v63 = vadd.f32 %v728_v48, %v204_v62  ;;  %v396_v48 = vld [vmem:[#allocation2 + $0x130] sm:$0xff] }
 0x119   :  { %477 = vmatpush.msra.mxu3 %v396_v48 }
 0x11a   :  { %v949_v0 = vmax.f32 %v205_v63, 0.0  ;;  %v361_v63 = vld [vmem:[#allocation2 + $0x18] sm:$0xff] }
 0x11b   :  { %478 = vmatpush.msra.mxu3 %v395_v53  ;;  %422 = vmatpush.msra.mxu1 %v361_v63 }
 0x11c   :  { %219 = vadd.xlane.f32.xlu0 %v949_v0  ;;  %v235_v1 = vmul.f32 %v949_v0, %v949_v0 }
 0x11d   :  { %479 = vmatpush.msra.mxu3 %v394_v59 }
 0x11e   :  { %242 = vadd.xlane.f32.xlu2 %v235_v1  ;;  %v376_v1 = vld [vmem:[#allocation2 + $0x90] sm:$0xff] }
 0x11f   :  { %452 = vmatpush.msra.mxu2 %v376_v1 }
 0x121   :  { %453 = vmatpush.msra.mxu2 %v375_v6 }
 0x123   :  { %454 = vmatpush.msra.mxu2 %v374_v10 }
 0x12f   :  { %72 = vperm.xlu1 %726, %v62_v2  }
 0x130   :  { %67 = vperm.xlu0 %725, %v61_v3   ;;  %v393_v3 = vld [vmem:[#allocation2 + $0x118] sm:$0xff] }
 0x131   :  { %480 = vmatpush.msra.mxu3 %v393_v3 }
 0x133   :  { %481 = vmatpush.msra.mxu3 %v392_v8 }
 0x135   :  { %482 = vmatpush.msra.mxu3 %v391_v12 }
 0x136   :  { %77 = vperm.xlu2 %727, %v63_v4  }
 0x137   :  { %82 = vperm.xlu1 %726, %v64_v5   ;;  %v360_v5 = vld [vmem:[#allocation2 + $0x10] sm:$0xff]  ;;  %483 = vmatpush.msra.mxu3 %v390_v15 }
 0x138   :  { %423 = vmatpush.msra.mxu1 %v360_v5 }
 0x13a   :  { %424 = vmatpush.msra.mxu1 %v359_v9 }
 0x13c   :  { %425 = vmatpush.msra.mxu1 %v358_v13 }
 0x177   :  { %v214_v37 = vpop.xlane.xlu2 %213 }
 0x178   :  { %v969_v39 = vmul.f32 %v966_v33, %v214_v37 }
 0x179   :  { %v237_v42 = vpop.xlane.xlu1 %236 }
 0x17a   :  { %v248_v44 = vmul.f32 %v969_v39, %v969_v39  ;;  %v244_v45 = vmul.f32 %v237_v42, %v966_v33 }
 0x17c   :  { %v252_v49 = vsub.f32 %v244_v45, %v248_v44  ;;  %v260_v44 = vsub.f32 %v934_v52, %v969_v39  ;;  %v730_v39 = vld [vmem:[%s1156_s5] ss:$0 sm:$0xff] }
 0x17e   :  { %v256_v54 = vmax.f32 %v252_v49, 0.0 }
 0x17f   :  { %v216_v58 = vpop.xlane.xlu0 %215 }
 0x180   :  { %v264_v61 = vadd.f32 1e-12, %v256_v54  ;;  %v975_v62 = vmul.f32 %v966_v33, %v216_v58 }
 0x181   :  { %v239_v2 = vpop.xlane.xlu2 %238 }
 0x182   :  { %737 = vrsqrt.f32 %v264_v61  ;;  %v249_v4 = vmul.f32 %v975_v62, %v975_v62  ;;  %v245_v7 = vmul.f32 %v239_v2, %v966_v33  ;;  %vm274_vm7 = vweird.f32 %v264_v61 }
 0x183   :  { %v261_v53 = vsub.f32 %v939_v56, %v975_v62 }
 0x184   :  { %v253_v11 = vsub.f32 %v245_v7, %v249_v4 }
 0x186   :  { %v257_v14 = vmax.f32 %v253_v11, 0.0 }
 0x188   :  { %v738_v16 = vpop.eup %737  ;;  %v265_v18 = vadd.f32 1e-12, %v257_v14 }
 0x189   :  { %v269_v17 = vmul.f32 %v738_v16, %v264_v61  ;;  %v241_v19 = vpop.xlane.xlu1 %240  ;;  %v218_v20 = vpop.xlane.xlu2 %217  ;;  %vm275_vm6 = vweird.f32 %v738_v16 }
 0x18a   :  { %v981_v21 = vmul.f32 %v966_v33, %v218_v20  ;;  %739 = vrsqrt.f32 %v265_v18  ;;  %v246_v23 = vmul.f32 %v241_v19, %v966_v33  ;;  %vm276_vm8 = vmor %vm274_vm7, %vm275_vm6  ;;  %vm284_vm10 = vweird.f32 %v265_v18 }
 0x18b   :  { %v270_v22 = vmul.f32 %v738_v16, %v269_v17 }
 0x18c   :  { %v250_v24 = vmul.f32 %v981_v21, %v981_v21  ;;  %v262_v9 = vsub.f32 %v944_v60, %v981_v21 }
 0x18d   :  { %v271_v25 = vmul.f32 0.5, %v270_v22 }
 0x18e   :  { %v254_v26 = vsub.f32 %v246_v23, %v250_v24 }
 0x18f   :  { %v272_v27 = vsub.f32 1.5, %v271_v25  ;;  %v220_v28 = vpop.xlane.xlu0 %219 }
 0x190   :  { %v258_v29 = vmax.f32 %v254_v26, 0.0  ;;  %v987_v30 = vmul.f32 %v966_v33, %v220_v28  ;;  %v740_v31 = vpop.eup %739 }
 0x191   :  { %v243_v32 = vpop.xlane.xlu2 %242  ;;  %v273_v34 = vmul.f32 %v738_v16, %v272_v27  ;;  %v279_v35 = vmul.f32 %v740_v31, %v265_v18  ;;  %vm285_vm9 = vweird.f32 %v740_v31 }
 0x192   :  { %v266_v36 = vadd.f32 1e-12, %v258_v29  ;;  %v251_v37 = vmul.f32 %v987_v30, %v987_v30  ;;  %v247_v38 = vmul.f32 %v243_v32, %v966_v33  ;;  %vm286_vm11 = vmor %vm284_vm10, %vm285_vm9  ;;  %v263_v21 = vsub.f32 %v949_v0, %v987_v30 }
 0x193   :  { %v280_v40 = vmul.f32 %v740_v31, %v279_v35  ;;  %v277_v43 = vsel %vm276_vm8, %v738_v16, %v273_v34 }
 0x194   :  { %741 = vrsqrt.f32 %v266_v36  ;;  %v255_v41 = vsub.f32 %v247_v38, %v251_v37  ;;  %v308_v49 = vmul.f32 %v277_v43, %v260_v44  ;;  %vm294_vm13 = vweird.f32 %v266_v36  ;;  %v731_v38 = vld [vmem:[%s1158_s7] ss:$0 sm:$0xff] }
 0x195   :  { %v281_v42 = vmul.f32 0.5, %v280_v40 }
 0x196   :  { %v259_v45 = vmax.f32 %v255_v41, 0.0  ;;  %v315_v58 = vmul.f32 %v729_v47, %v308_v49 }
 0x197   :  { %v282_v46 = vsub.f32 1.5, %v281_v42 }
 0x198   :  { %v267_v48 = vadd.f32 1e-12, %v259_v45  ;;  %v322_v56 = vadd.f32 %v730_v39, %v315_v58 }
 0x199   :  { %v283_v51 = vmul.f32 %v740_v31, %v282_v46  ;;  %v1020_v25 = vpop.permute.xlu2 %77 }
 0x19a   :  { %v742_v50 = vpop.eup %741  ;;  %743 = vrsqrt.f32 %v267_v48  ;;  %vm304_vm3 = vweird.f32 %v267_v48 }
 0x19b   :  { %v289_v54 = vmul.f32 %v742_v50, %v266_v36  ;;  %v287_v55 = vsel %vm286_vm11, %v740_v31, %v283_v51  ;;  %vm295_vm12 = vweird.f32 %v742_v50 }
 0x19c   :  { %v309_v57 = vmul.f32 %v287_v55, %v261_v53  ;;  %vm296_vm15 = vmor %vm294_vm13, %vm295_vm12 }
 0x19d   :  { %v290_v52 = vmul.f32 %v742_v50, %v289_v54 }
 0x19e   :  { %v316_v61 = vmul.f32 %v729_v47, %v309_v57 }
 0x19f   :  { %v291_v59 = vmul.f32 0.5, %v290_v52 }
 0x1a0   :  { %v744_v63 = vpop.eup %743  ;;  %v323_v3 = vadd.f32 %v730_v39, %v316_v61 }
 0x1a1   :  { %v292_v1 = vsub.f32 1.5, %v291_v59  ;;  %v1002_v2 = vpop.permute.xlu1 %72  ;;  %v299_v62 = vmul.f32 %v744_v63, %v267_v48  ;;  %vm305_vm2 = vweird.f32 %v744_v63 }
 0x1a2   :  { %v1004_v4 = vpop.permute.xlu0 %67  ;;  %v327_v6 = vmul.f32 %v323_v3, %v1002_v2  ;;  %vm306_vm4 = vmor %vm304_vm3, %vm305_vm2 }
 0x1a3   :  { %v293_v5 = vmul.f32 %v742_v50, %v292_v1  ;;  %v326_v7 = vmul.f32 %v322_v56, %v1004_v4  ;;  %v300_v10 = vmul.f32 %v744_v63, %v299_v62 }
 0x1a4   :  { %v347_v14 = vrot.slane %v327_v6, 1  ;;  %v335_v60 = vrot.slane %v327_v6, 7 }
 0x1a5   :  { %v297_v11 = vsel %vm296_vm15, %v742_v50, %v293_v5  ;;  %455 = vmatmul.f32.vlgmr.msra.gmra.mxu2 %v326_v7  ;;  %v334_v12 = vrot.slane %v326_v7, 7  ;;  %v346_v13 = vrot.slane %v326_v7, 1  ;;  %v301_v16 = vmul.f32 0.5, %v300_v10 }
 0x1a6   :  { %v310_v15 = vmul.f32 %v297_v11, %v262_v9  ;;  %v628_v11 = vld [vmem:[%s1161_s10 + $0x78] sm:$0xff]  ;;  %vm666_vm15 = vcmask 15360  }
 0x1a7   :  { %681 = vmatmul.msk.f32.vlgmr.msra.gmra.mxu1 %vm1009_vm14, %v334_v12  ;;  %v348_v17 = vsel %vm102_vm0, %v346_v13, %v347_v14  ;;  %v302_v18 = vsub.f32 1.5, %v301_v16  ;;  %v336_v26 = vsel %vm89_vm1, %v334_v12, %v335_v60  ;;  %633 = vmatpush.msrb.mxu0 %v628_v11  ;;  %v627_v12 = vld [vmem:[%s1161_s10 + $0x70] sm:$0xff]  ;;  %v626_v13 = vld [vmem:[%s1161_s10 + $0x68] sm:$0xff] }
 0x1a8   :  { %484 = vmatmul.f32.vlgmr.msra.gmra.mxu3 %v348_v17  ;;  %v317_v19 = vmul.f32 %v729_v47, %v310_v15  ;;  %687 = vmatpush.msrb.mxu2 %v628_v11  ;;  %v624_v15 = vld [vmem:[%s1161_s10 + $0x58] sm:$0xff]  ;;  %v623_v16 = vld [vmem:[%s1161_s10 + $0x50] sm:$0xff]  ;;  %v622_v17 = vld [vmem:[%s1161_s10 + $0x48] sm:$0xff] }
 0x1a9   :  { %v303_v20 = vmul.f32 %v744_v63, %v302_v18  ;;  %v1025_v31 = vpop.permute.xlu1 %82  ;;  %686 = vmatpush.msrb.mxu1 %v628_v11  ;;  %634 = vmatpush.msrb.mxu0 %v627_v12  ;;  %v621_v18 = vld [vmem:[%s1161_s10 + $0x40] sm:$0xff]  ;;  %v618_v60 = vld [vmem:[%s1161_s10 + $0x28] sm:$0xff] }
 0x1aa   :  { %v324_v24 = vadd.f32 %v730_v39, %v317_v19  ;;  %689 = vmatpush.msrb.mxu2 %v627_v12  ;;  %v620_v19 = vld [vmem:[%s1161_s10 + $0x38] sm:$0xff] }
 0x1ab   :  { %v307_v22 = vsel %vm306_vm4, %v744_v63, %v303_v20  ;;  %688 = vmatpush.msrb.mxu1 %v627_v12  ;;  %635 = vmatpush.msrb.mxu0 %v626_v13  ;;  %v619_v20 = vld [vmem:[%s1161_s10 + $0x30] sm:$0xff] }
 0x1ac   :  { %v311_v23 = vmul.f32 %v307_v22, %v263_v21  ;;  %v328_v29 = vmul.f32 %v324_v24, %v1020_v25  ;;  %691 = vmatpush.msrb.mxu2 %v626_v13  ;;  %v617_v21 = vld [vmem:[%s1161_s10 + $0x20] sm:$0xff]  ;;  %v616_v22 = vld [vmem:[%s1161_s10 + $0x18] sm:$0xff] }
 0x1ad   :  { %458 = vmatmul.f32.gmra.mxu2 %v327_v6  ;;  %690 = vmatpush.msrb.mxu1 %v626_v13 }
 0x1ae   :  { %v318_v27 = vmul.f32 %v729_v47, %v311_v23  ;;  %v337_v30 = vrot.slane %v328_v29, 7  ;;  %v349_v32 = vrot.slane %v328_v29, 1 }
 0x1af   :  { %429 = vmatmul.f32.gmra.mxu1 %v336_v26  ;;  %v615_v26 = vld [vmem:[%s1161_s10 + $0x10] sm:$0xff] }
 0x1b0   :  { %684 = vmatmul.msk.f32.gmra.mxu3 %vm102_vm0, %v347_v14  ;;  %v325_v28 = vadd.f32 %v730_v39, %v318_v27  ;;  %v625_v14 = vld [vmem:[%s1161_s10 + $0x60] sm:$0xff] }
 0x1b1   :  { %636 = vmatpush.msrb.mxu0 %v625_v14  ;;  %693 = vmatpush.msrb.mxu2 %v625_v14 }
 0x1b2   :  { %v329_v0 = vmul.f32 %v325_v28, %v1025_v31  ;;  %692 = vmatpush.msrb.mxu1 %v625_v14 }
 0x1b3   :  { %637 = vmatpush.msrb.mxu0 %v624_v15  ;;  %695 = vmatpush.msrb.mxu2 %v624_v15 }
 0x1b4   :  { %v350_v34 = vrot.slane %v329_v0, 1  ;;  %v338_v36 = vrot.slane %v329_v0, 7  ;;  %694 = vmatpush.msrb.mxu1 %v624_v15 }
 0x1b5   :  { %461 = vmatmul.f32.gmra.mxu2 %v328_v29  ;;  %638 = vmatpush.msrb.mxu0 %v623_v16 }
 0x1b6   :  { %v351_v35 = vsel %vm102_vm0, %v349_v32, %v350_v34  ;;  %v339_v37 = vsel %vm89_vm1, %v337_v30, %v338_v36  ;;  %697 = vmatpush.msrb.mxu2 %v623_v16  ;;  %696 = vmatpush.msrb.mxu1 %v623_v16  ;;  %v613_v32 = vld [vmem:[%s1161_s10] sm:$0xff] }
 0x1b7   :  { %683 = vmatmul.msk.f32.gmra.mxu1 %vm1009_vm14, %v337_v30  ;;  %639 = vmatpush.msrb.mxu0 %v622_v17 }
 0x1b8   :  { %490 = vmatmul.f32.gmra.mxu3 %v351_v35  ;;  %699 = vmatpush.msrb.mxu2 %v622_v17 }
 0x1b9   :  { %698 = vmatpush.msrb.mxu1 %v622_v17  ;;  %640 = vmatpush.msrb.mxu0 %v621_v18 }
 0x1ba   :  { %701 = vmatpush.msrb.mxu2 %v621_v18 }
 0x1bb   :  { %700 = vmatpush.msrb.mxu1 %v621_v18  ;;  %641 = vmatpush.msrb.mxu0 %v620_v19 }
 0x1bc   :  { %703 = vmatpush.msrb.mxu2 %v620_v19 }
 0x1bd   :  { %464 = vmatmul.f32.gmra.mxu2 %v329_v0  ;;  %702 = vmatpush.msrb.mxu1 %v620_v19  ;;  %v614_v0 = vld [vmem:[%s1161_s10 + $0x8] sm:$0xff] }
 0x1be   :  { %642 = vmatpush.msrb.mxu0 %v619_v20  ;;  %705 = vmatpush.msrb.mxu2 %v619_v20 }
 0x1bf   :  { %435 = vmatmul.f32.gmra.mxu1 %v339_v37 }
 0x1c0   :  { %685 = vmatmul.msk.f32.gmra.mxu3 %vm102_vm0, %v350_v34  ;;  %704 = vmatpush.msrb.mxu1 %v619_v20 }
 0x1c1   :  { %643 = vmatpush.msrb.mxu0 %v618_v60  ;;  %707 = vmatpush.msrb.mxu2 %v618_v60 }
 0x1c2   :  { %706 = vmatpush.msrb.mxu1 %v618_v60 }
 0x1c3   :  { %644 = vmatpush.msrb.mxu0 %v617_v21  ;;  %709 = vmatpush.msrb.mxu2 %v617_v21 }
 0x1c4   :  { %708 = vmatpush.msrb.mxu1 %v617_v21 }
 0x1c5   :  { %645 = vmatpush.msrb.mxu0 %v616_v22  ;;  %711 = vmatpush.msrb.mxu2 %v616_v22 }
 0x1c6   :  { %710 = vmatpush.msrb.mxu1 %v616_v22 }
 0x1c7   :  { %646 = vmatpush.msrb.mxu0 %v615_v26  ;;  %713 = vmatpush.msrb.mxu2 %v615_v26 }
 0x1c8   :  { %712 = vmatpush.msrb.mxu1 %v615_v26 }
 0x1c9   :  { %647 = vmatpush.msrb.mxu0 %v614_v0  ;;  %715 = vmatpush.msrb.mxu2 %v614_v0 }
 0x1ca   :  { %714 = vmatpush.msrb.mxu1 %v614_v0 }
 0x1cb   :  { %648 = vmatpush.msrb.mxu0 %v613_v32  ;;  %717 = vmatpush.msrb.mxu2 %v613_v32 }
 0x1cc   :  { %716 = vmatpush.msrb.mxu1 %v613_v32 }
 0x224   :  { %v427_v40 = vpop.f32.mrf.mxu1 }
 0x225   :  { %v428_v41 = vadd.f32 %v731_v38, %v427_v40 }
 0x228   :  { %v456_v42 = vpop.f32.mrf.mxu2 }
 0x229   :  { %v457_v43 = vadd.f32 %v456_v42, %v428_v41 }
 0x22b   :  { %v485_v44 = vpop.f32.mrf.mxu3 }
 0x22c   :  { %v486_v45 = vadd.f32 %v485_v44, %v457_v43  ;;  %v430_v46 = vpop.f32.mrf.mxu1 }
 0x22d   :  { %v431_v48 = vadd.f32 %v731_v38, %v430_v46 }
 0x22e   :  { %v1036_v47 = vmax.f32 %v486_v45, 0.0 }
 0x230   :  { %v459_v49 = vpop.f32.mrf.mxu2  ;;  %503 = vadd.xlane.f32.xlu2 %v1036_v47  ;;  %v515_v50 = vmul.f32 %v1036_v47, %v1036_v47 }
 0x231   :  { %v460_v51 = vadd.f32 %v459_v49, %v431_v48 }
 0x232   :  { %519 = vadd.xlane.f32.xlu0 %v515_v50 }
 0x233   :  { %v488_v53 = vpop.f32.mrf.mxu3 }
 0x234   :  { %v489_v54 = vadd.f32 %v488_v53, %v460_v51  ;;  %v433_v55 = vpop.f32.mrf.mxu1 }
 0x235   :  { %v434_v63 = vadd.f32 %v731_v38, %v433_v55 }
 0x236   :  { %v1041_v52 = vmax.f32 %v489_v54, 0.0 }
 0x238   :  { %505 = vadd.xlane.f32.xlu1 %v1041_v52  ;;  %v462_v39 = vpop.f32.mrf.mxu2  ;;  %v516_v57 = vmul.f32 %v1041_v52, %v1041_v52 }
 0x239   :  { %v463_v56 = vadd.f32 %v462_v39, %v434_v63 }
 0x23a   :  { %521 = vadd.xlane.f32.xlu0 %v516_v57 }
 0x23b   :  { %v491_v58 = vpop.f32.mrf.mxu3 }
 0x23c   :  { %v436_v59 = vpop.f32.mrf.mxu1  ;;  %v492_v6 = vadd.f32 %v491_v58, %v463_v56 }
 0x23d   :  { %v437_v61 = vadd.f32 %v731_v38, %v436_v59 }
 0x23e   :  { %v1051_v9 = vmax.f32 %v492_v6, 0.0 }
 0x240   :  { %v465_v1 = vpop.f32.mrf.mxu2  ;;  %v517_v10 = vmul.f32 %v1051_v9, %v1051_v9 }
 0x241   :  { %v466_v3 = vadd.f32 %v465_v1, %v437_v61  ;;  %v1113_v61 = vld [vmem:[%s1159_s8] ss:$0 sm:$0xff] }
 0x243   :  { %v494_v62 = vpop.f32.mrf.mxu3 }
 0x244   :  { %v495_v5 = vadd.f32 %v494_v62, %v466_v3  ;;  %v733_v62 = vld [vmem:[%s1160_s9] ss:$0 sm:$0xff] }
 0x246   :  { %v1046_v7 = vmax.f32 %v495_v5, 0.0 }
 0x248   :  { %509 = vadd.xlane.f32.xlu1 %v1046_v7  ;;  %v518_v8 = vmul.f32 %v1046_v7, %v1046_v7 }
 0x24a   :  { %525 = vadd.xlane.f32.xlu2 %v518_v8 }
 0x250   :  { %523 = vadd.xlane.f32.xlu1 %v517_v10 }
 0x252   :  { %507 = vadd.xlane.f32.xlu2 %v1051_v9 }
 0x2a3   :  { %v504_v23 = vpop.xlane.xlu2 %503 }
 0x2a4   :  { %v511_v24 = vmul.f32 %v504_v23, %v966_v33 }
 0x2a5   :  { %v520_v27 = vpop.xlane.xlu0 %519 }
 0x2a6   :  { %v531_v28 = vmul.f32 %v511_v24, %v511_v24  ;;  %v527_v29 = vmul.f32 %v520_v27, %v966_v33  ;;  %v543_v57 = vsub.f32 %v1036_v47, %v511_v24 }
 0x2a8   :  { %v535_v30 = vsub.f32 %v527_v29, %v531_v28 }
 0x2aa   :  { %v539_v34 = vmax.f32 %v535_v30, 0.0 }
 0x2ab   :  { %v506_v35 = vpop.xlane.xlu1 %505 }
 0x2ac   :  { %v547_v36 = vadd.f32 1e-12, %v539_v34  ;;  %v512_v37 = vmul.f32 %v506_v35, %v966_v33 }
 0x2ad   :  { %v522_v38 = vpop.xlane.xlu0 %521 }
 0x2ae   :  { %745 = vrsqrt.f32 %v547_v36  ;;  %v532_v40 = vmul.f32 %v512_v37, %v512_v37  ;;  %v528_v41 = vmul.f32 %v522_v38, %v966_v33  ;;  %vm557_vm1 = vweird.f32 %v547_v36 }
 0x2af   :  { %v544_v18 = vsub.f32 %v1041_v52, %v512_v37 }
 0x2b0   :  { %v536_v42 = vsub.f32 %v528_v41, %v532_v40 }
 0x2b2   :  { %v540_v43 = vmax.f32 %v536_v42, 0.0 }
 0x2b4   :  { %v746_v44 = vpop.eup %745  ;;  %v548_v46 = vadd.f32 1e-12, %v540_v43 }
 0x2b5   :  { %v552_v45 = vmul.f32 %v746_v44, %v547_v36  ;;  %vm558_vm0 = vweird.f32 %v746_v44 }
 0x2b6   :  { %747 = vrsqrt.f32 %v548_v46  ;;  %vm559_vm5 = vmor %vm557_vm1, %vm558_vm0  ;;  %vm567_vm7 = vweird.f32 %v548_v46 }
 0x2b7   :  { %v553_v48 = vmul.f32 %v746_v44, %v552_v45 }
 0x2b9   :  { %v554_v49 = vmul.f32 0.5, %v553_v48 }
 0x2bb   :  { %v555_v50 = vsub.f32 1.5, %v554_v49  ;;  %v510_v51 = vpop.xlane.xlu1 %509 }
 0x2bc   :  { %v514_v53 = vmul.f32 %v510_v51, %v966_v33  ;;  %v748_v54 = vpop.eup %747 }
 0x2bd   :  { %v556_v55 = vmul.f32 %v746_v44, %v555_v50  ;;  %v526_v39 = vpop.xlane.xlu2 %525  ;;  %v562_v58 = vmul.f32 %v748_v54, %v548_v46  ;;  %vm568_vm6 = vweird.f32 %v748_v54 }
 0x2be   :  { %v534_v59 = vmul.f32 %v514_v53, %v514_v53  ;;  %v530_v63 = vmul.f32 %v526_v39, %v966_v33  ;;  %vm569_vm8 = vmor %vm567_vm7, %vm568_vm6  ;;  %v546_v35 = vsub.f32 %v1046_v7, %v514_v53 }
 0x2bf   :  { %v560_v1 = vsel %vm559_vm5, %v746_v44, %v556_v55  ;;  %v563_v3 = vmul.f32 %v748_v54, %v562_v58 }
 0x2c0   :  { %v591_v56 = vmul.f32 %v560_v1, %v543_v57  ;;  %v538_v5 = vsub.f32 %v530_v63, %v534_v59 }
 0x2c1   :  { %v564_v6 = vmul.f32 0.5, %v563_v3 }
 0x2c2   :  { %v598_v47 = vmul.f32 %v1113_v61, %v591_v56  ;;  %v542_v8 = vmax.f32 %v538_v5, 0.0 }
 0x2c3   :  { %v565_v10 = vsub.f32 1.5, %v564_v6  ;;  %v524_v13 = vpop.xlane.xlu1 %523 }
 0x2c4   :  { %v605_v11 = vadd.f32 %v733_v62, %v598_v47  ;;  %v550_v12 = vadd.f32 1e-12, %v542_v8  ;;  %v529_v19 = vmul.f32 %v524_v13, %v966_v33 }
 0x2c5   :  { %v508_v14 = vpop.xlane.xlu2 %507  ;;  %v566_v17 = vmul.f32 %v748_v54, %v565_v10 }
 0x2c6   :  { %v513_v15 = vmul.f32 %v508_v14, %v966_v33  ;;  %v609_v16 = vmul.f32 %v605_v11, %v1004_v4  ;;  %749 = vrsqrt.f32 %v550_v12  ;;  %vm587_vm10 = vweird.f32 %v550_v12 }
 0x2c7   :  { %v570_v60 = vsel %vm569_vm8, %v748_v54, %v566_v17  ;;  %v734_v54 = vld [vmem:[%s1162_s11] ss:$0 sm:$0xff] }
 0x2c8   :  { %v533_v20 = vmul.f32 %v513_v15, %v513_v15  ;;  %649 = vmatmul.f32.vlgmr.msrb.gmra.mxu0 %v609_v16  ;;  %v592_v21 = vmul.f32 %v570_v60, %v544_v18  ;;  %v545_v48 = vsub.f32 %v1051_v9, %v513_v15 }
 0x2ca   :  { %v537_v22 = vsub.f32 %v529_v19, %v533_v20  ;;  %v599_v23 = vmul.f32 %v1113_v61, %v592_v21 }
 0x2cc   :  { %v541_v24 = vmax.f32 %v537_v22, 0.0  ;;  %v750_v26 = vpop.eup %749  ;;  %v606_v27 = vadd.f32 %v733_v62, %v599_v23 }
 0x2cd   :  { %v582_v28 = vmul.f32 %v750_v26, %v550_v12  ;;  %vm588_vm9 = vweird.f32 %v750_v26 }
 0x2ce   :  { %v549_v29 = vadd.f32 1e-12, %v541_v24  ;;  %v610_v0 = vmul.f32 %v606_v27, %v1002_v2  ;;  %vm589_vm11 = vmor %vm587_vm10, %vm588_vm9 }
 0x2cf   :  { %v583_v30 = vmul.f32 %v750_v26, %v582_v28 }
 0x2d0   :  { %751 = vrsqrt.f32 %v549_v29  ;;  %652 = vmatmul.f32.gmra.mxu0 %v610_v0  ;;  %vm577_vm13 = vweird.f32 %v549_v29 }
 0x2d1   :  { %v584_v52 = vmul.f32 0.5, %v583_v30 }
 0x2d3   :  { %v585_v32 = vsub.f32 1.5, %v584_v52 }
 0x2d5   :  { %v586_v34 = vmul.f32 %v750_v26, %v585_v32 }
 0x2d6   :  { %v752_v33 = vpop.eup %751 }
 0x2d7   :  { %v572_v36 = vmul.f32 %v752_v33, %v549_v29  ;;  %v590_v37 = vsel %vm589_vm11, %v750_v26, %v586_v34  ;;  %vm578_vm12 = vweird.f32 %v752_v33 }
 0x2d8   :  { %v594_v40 = vmul.f32 %v590_v37, %v546_v35  ;;  %vm579_vm14 = vmor %vm577_vm13, %vm578_vm12 }
 0x2d9   :  { %v573_v38 = vmul.f32 %v752_v33, %v572_v36 }
 0x2da   :  { %v601_v42 = vmul.f32 %v1113_v61, %v594_v40 }
 0x2db   :  { %v574_v41 = vmul.f32 0.5, %v573_v38 }
 0x2dc   :  { %v608_v44 = vadd.f32 %v733_v62, %v601_v42 }
 0x2dd   :  { %v575_v43 = vsub.f32 1.5, %v574_v41 }
 0x2de   :  { %v612_v46 = vmul.f32 %v608_v44, %v1025_v31 }
 0x2df   :  { %v576_v45 = vmul.f32 %v752_v33, %v575_v43 }
 0x2e0   :  { %658 = vmatmul.f32.vlgmr.msrb.gmra.mxu2 %v612_v46 }
 0x2e1   :  { %v580_v49 = vsel %vm579_vm14, %v752_v33, %v576_v45 }
 0x2e2   :  { %v593_v7 = vmul.f32 %v580_v49, %v545_v48 }
 0x2e4   :  { %v600_v50 = vmul.f32 %v1113_v61, %v593_v7 }
 0x2e6   :  { %v607_v51 = vadd.f32 %v733_v62, %v600_v50 }
 0x2e8   :  { %v611_v53 = vmul.f32 %v607_v51, %v1020_v25 }
 0x2ea   :  { %655 = vmatmul.f32.vlgmr.msrb.gmra.mxu1 %v611_v53 }
 0x345   :  { %v650_v55 = vpop.f32.mrf.mxu0 }
 0x346   :  { %v651_v39 = vadd.f32 %v734_v54, %v650_v55 }
 0x348   :  { %v662_v57 = vmul.f32 %v651_v39, %v1004_v4 }
 0x34a   :  { %667 = vst.msk [vmem:[%s1163_s12] sm:$0xff] %vm666_vm15, %v662_v57 }
 0x34d   :  { %v653_v9 = vpop.f32.mrf.mxu0 }
 0x34e   :  { %v654_v58 = vadd.f32 %v734_v54, %v653_v9 }
 0x350   :  { %v663_v59 = vmul.f32 %v654_v58, %v1002_v2 }
 0x352   :  { %668 = vst.msk [vmem:[%s1163_s12 + $0x8] sm:$0xff] %vm666_vm15, %v663_v59 }
 0x363   :  { %v659_v61 = vpop.f32.mrf.mxu2 }
 0x364   :  { %v660_v63 = vadd.f32 %v734_v54, %v659_v61 }
 0x366   :  { %v665_v1 = vmul.f32 %v660_v63, %v1025_v31 }
 0x367   :  { %v656_v3 = vpop.f32.mrf.mxu1 }
 0x368   :  { %v657_v56 = vadd.f32 %v734_v54, %v656_v3  ;;  %670 = vst.msk [vmem:[%s1163_s12 + $0x18] sm:$0xff] %vm666_vm15, %v665_v1 }
 0x36a   :  { %v664_v4 = vmul.f32 %v657_v56, %v1020_v25 }
 0x36c   :  { %669 = vst.msk [vmem:[%s1163_s12 + $0x10] sm:$0xff] %vm666_vm15, %v664_v4 }
 0x36d   :  { %675 = vsyncpa [#allocation3], 1 }

</bundles_post_ra>
